<compile_context>
chip_gen: v5e
topology: v5e:2x2
jax: 0.10.0
libtpu: 0.0.40
codegen_flags: <defaults>
</compile_context>

<pallas_src>
import jax
import jax.numpy as jnp
from jax.experimental import pallas as pl
from jax.experimental.pallas import tpu as pltpu

IMAGENET_MEAN = (0.485, 0.456, 0.406)
IMAGENET_STD = (0.229, 0.224, 0.225)


def _round_up(x, m):
    return ((x + m - 1) // m) * m


# ----------------------------- Pallas kernel -------------------------------

def _fused_matting_kernel(x_ref, w_ref, b_ref, o_ref):
    """Fused normalize + 3x3 conv + bias + sigmoid over one row tile.

    x_ref: (3, TH+2, Win) f32 VMEM   mean-shifted raw image rows (1-px halo,
                                     real image starts at row 1 / col 1)
    w_ref: (27,) f32 SMEM            normalization-folded taps, (c, dy, dx)
    b_ref: (1,)  f32 SMEM            bias
    o_ref: (TH, Wout) f32 VMEM       alpha rows (lane-dense, Wout % 128 == 0)
    """
    TH, W = o_ref.shape
    acc = jnp.full((TH, W), b_ref[0], dtype=jnp.float32)
    for c in range(3):                       # 27 taps, fully unrolled VPU MACs
        for dy in range(3):
            for dx in range(3):
                tap = x_ref[c, dy:dy + TH, dx:dx + W]
                acc = acc + w_ref[(c * 3 + dy) * 3 + dx] * tap
    # Numerically stable sigmoid: exp on the EUP + approximate reciprocal.
    e = jnp.exp(-jnp.abs(acc))
    r = pl.reciprocal(1.0 + e, approx=True)
    o_ref[...] = jnp.where(acc >= 0.0, r, e * r)


# ------------------------------- JAX wrapper --------------------------------

def init_params(key):
    """Synthetic, deterministic parameters for the matting head."""
    kw, kb = jax.random.split(key)
    conv_w = jax.random.normal(kw, (1, 3, 3, 3), jnp.float32) * 0.1  # (O,I,kh,kw)
    conv_b = jax.random.normal(kb, (1,), jnp.float32) * 0.1
    return conv_w, conv_b


def _choose_tile_h(block_h, Hp, Win, Wpad, budget_bytes=12 * 1024 * 1024):
    """Largest TH <= block_h (multiple of 8) whose double-buffered blocks fit."""
    th = max(8, _round_up(min(int(block_h), Hp), 8))
    while th > 8:
        need = 2 * 4 * (3 * (th + 2) * Win + th * Wpad)   # in + out, 2 buffers
        if need <= budget_bytes:
            break
        th -= 8
    return th


def matting_forward(img_hwc, conv_w, conv_b, *, block_h=256):
    """Mirrors MattingModel.forward: HWC image in [0,255] -> (h, w) alpha."""
    h, w, _ = img_hwc.shape
    if h % 8 != 0 or w % 8 != 0:
        # cv2.BORDER_REFLECT (edge included) == jnp 'symmetric'; pad amounts
        # replicate the original module exactly (top/left, cropped at the end).
        img_hwc = jnp.pad(
            img_hwc, ((8 - h % 8, 0), (8 - w % 8, 0), (0, 0)), mode="symmetric"
        )

    x = jnp.transpose(img_hwc, (2, 0, 1)).astype(jnp.float32)       # (3,Hp,Wp)
    _, Hp, Wp = x.shape

    mean = jnp.asarray(IMAGENET_MEAN, jnp.float32)
    inv_std = 1.0 / jnp.asarray(IMAGENET_STD, jnp.float32)

    # Fold the affine normalization into the conv at trace time:
    #   normalize(x) = (x - 255*mean) * (inv_std/255)
    # so shift the raw image by 255*mean once and scale the conv taps by
    # inv_std/255.  Bias is unchanged, and zero padding of the shifted image
    # == zero padding in normalized space (matches SAME padding).
    x_shift = x - (255.0 * mean)[:, None, None]
    w_fold = conv_w[0] * (inv_std / 255.0)[:, None, None]           # (3,3,3)
    w_flat = w_fold.reshape(-1).astype(jnp.float32)                 # (c,dy,dx)
    b_arr = conv_b.reshape(1).astype(jnp.float32)

    # TODO(synk): StyleMatte backbone (checkpoint-defined encoder/FPN) is not
    # available in the reference source; this synthetic normalization-folded
    # 3x3 conv + sigmoid head stands in for it.

    # Geometry: lane-dense output width, row tiles of TH with a 1-px halo.
    Wpad = _round_up(Wp, 128)          # output width -> unmasked vst
    Win = Wpad + 128                   # input width: +1 col halo, stays aligned
    TH = _choose_tile_h(block_h, Hp, Win, Wpad)
    Hpad = _round_up(Hp, TH)
    nt = Hpad // TH

    # Real image occupies rows [1, 1+Hp), cols [1, 1+Wp); rest is normalized 0.
    xp = jnp.pad(x_shift, ((0, 0), (1, Hpad - Hp + 1), (1, Win - Wp - 1)))
    # Row tiles with a 1-row halo top/bottom (duplication overhead = 2/TH).
    # TODO(synk): this small staging copy could be removed with a manual-DMA
    # halo fetch (memory_space=pl.ANY + make_async_copy) if HBM-bound.
    tiles = jnp.stack([xp[:, i * TH:i * TH + TH + 2, :] for i in range(nt)], 0)

    alpha_full = pl.pallas_call(
        _fused_matting_kernel,
        out_shape=jax.ShapeDtypeStruct((Hpad, Wpad), jnp.float32),
        grid=(nt,),
        in_specs=[
            pl.BlockSpec((None, 3, TH + 2, Win), lambda i: (i, 0, 0, 0)),
            pl.BlockSpec(memory_space=pltpu.MemorySpace.SMEM),      # taps
            pl.BlockSpec(memory_space=pltpu.MemorySpace.SMEM),      # bias
        ],
        out_specs=pl.BlockSpec((TH, Wpad), lambda i: (i, 0)),
        compiler_params=pltpu.CompilerParams(
            dimension_semantics=("parallel",),
            vmem_limit_bytes=32 * 1024 * 1024),
    )(tiles, w_flat, b_arr)

    alpha = alpha_full[:Hp, :Wp]
    return alpha[-h:, -w:]             # == out[0][:, -h:, -w:][0] in torch


def matting_forward_ref(img_hwc, conv_w, conv_b):
    """Pure-JAX reference of the same synthetic forward (for checking)."""
    h, w, _ = img_hwc.shape
    if h % 8 != 0 or w % 8 != 0:
        img_hwc = jnp.pad(
            img_hwc, ((8 - h % 8, 0), (8 - w % 8, 0), (0, 0)), mode="symmetric"
        )
    x = jnp.transpose(img_hwc, (2, 0, 1)).astype(jnp.float32) / 255.0
    mean = jnp.asarray(IMAGENET_MEAN, jnp.float32)[:, None, None]
    std = jnp.asarray(IMAGENET_STD, jnp.float32)[:, None, None]
    xn = (x - mean) / std
    z = jax.lax.conv_general_dilated(
        xn[None], conv_w, window_strides=(1, 1), padding="SAME",
        dimension_numbers=("NCHW", "OIHW", "NCHW"))[0, 0] + conv_b[0]
    alpha = jax.nn.sigmoid(z)
    return alpha[-h:, -w:]


if __name__ == "__main__":
    key = jax.random.PRNGKey(0)
    k_img, k_par = jax.random.split(key)
    # Small HWC "image" in [0, 255]; h, w not multiples of 8 so the reflect-pad
    # path is exercised; block_h=16 gives a 3-step (pipelined) row grid.
    h, w = 44, 60
    img = jax.random.uniform(k_img, (h, w, 3), jnp.float32, 0.0, 255.0)
    conv_w, conv_b = init_params(k_par)

    fwd = jax.jit(lambda a, b, c: matting_forward(a, b, c, block_h=16))
    alpha = fwd(img, conv_w, conv_b)
    jax.block_until_ready(alpha)

    assert alpha.shape == (h, w), alpha.shape
    assert alpha.dtype == jnp.float32
    assert bool(jnp.all(jnp.isfinite(alpha)))

    ref = matting_forward_ref(img, conv_w, conv_b)
    max_err = float(jnp.max(jnp.abs(alpha - ref)))
    assert max_err < 2e-2, max_err     # approx reciprocal -> loose tolerance
    print("KERNEL_OK")
</pallas_src>

<mosaic_0001>
module attributes {stable_mosaic.version = 11 : i64} {
  func.func @_fused_matting_kernel(%arg0: i32, %arg1: memref<1x3x18x256xf32, #tpu.memory_space<vmem>>, %arg2: memref<27xf32, #tpu.memory_space<smem>>, %arg3: memref<1xf32, #tpu.memory_space<smem>>, %arg4: memref<16x128xf32, #tpu.memory_space<vmem>>) attributes {dimension_semantics = [#tpu.dimension_semantics<parallel>], iteration_bounds = array<i64: 3>, scalar_prefetch = 0 : i64, scratch_operands = 0 : i64, tpu.core_type = #tpu.core_type<tc>, window_params = [{transform_indices = @transform_0, window_bounds = array<i64: 1, 3, 18, 256>}, {transform_indices = @transform_1, window_bounds = array<i64: 27>}, {transform_indices = @transform_2, window_bounds = array<i64: 1>}, {transform_indices = @transform_3, window_bounds = array<i64: 16, 128>}]} {
    %c0 = arith.constant 0 : index
    %0 = memref.load %arg3[%c0] : memref<1xf32, #tpu.memory_space<smem>>
    %1 = vector.broadcast %0 : f32 to vector<16x128xf32>
    %c0_0 = arith.constant 0 : index
    %c0_1 = arith.constant 0 : index
    %c0_2 = arith.constant 0 : index
    %c0_3 = arith.constant 0 : index
    %2 = vector.load %arg1[%c0_0, %c0_1, %c0_2, %c0_3] : memref<1x3x18x256xf32, #tpu.memory_space<vmem>>, vector<1x1x16x128xf32>
    %3 = vector.shape_cast %2 : vector<1x1x16x128xf32> to vector<16x128xf32>
    %c0_4 = arith.constant 0 : index
    %4 = memref.load %arg2[%c0_4] : memref<27xf32, #tpu.memory_space<smem>>
    %5 = vector.broadcast %4 : f32 to vector<16x128xf32>
    %6 = arith.mulf %5, %3 : vector<16x128xf32>
    %7 = arith.addf %1, %6 : vector<16x128xf32>
    %c0_5 = arith.constant 0 : index
    %c0_6 = arith.constant 0 : index
    %c0_7 = arith.constant 0 : index
    %c1 = arith.constant 1 : index
    %8 = vector.load %arg1[%c0_5, %c0_6, %c0_7, %c1] : memref<1x3x18x256xf32, #tpu.memory_space<vmem>>, vector<1x1x16x128xf32>
    %9 = vector.shape_cast %8 : vector<1x1x16x128xf32> to vector<16x128xf32>
    %c1_8 = arith.constant 1 : index
    %10 = memref.load %arg2[%c1_8] : memref<27xf32, #tpu.memory_space<smem>>
    %11 = vector.broadcast %10 : f32 to vector<16x128xf32>
    %12 = arith.mulf %11, %9 : vector<16x128xf32>
    %13 = arith.addf %7, %12 : vector<16x128xf32>
    %c0_9 = arith.constant 0 : index
    %c0_10 = arith.constant 0 : index
    %c0_11 = arith.constant 0 : index
    %c2 = arith.constant 2 : index
    %14 = vector.load %arg1[%c0_9, %c0_10, %c0_11, %c2] : memref<1x3x18x256xf32, #tpu.memory_space<vmem>>, vector<1x1x16x128xf32>
    %15 = vector.shape_cast %14 : vector<1x1x16x128xf32> to vector<16x128xf32>
    %c2_12 = arith.constant 2 : index
    %16 = memref.load %arg2[%c2_12] : memref<27xf32, #tpu.memory_space<smem>>
    %17 = vector.broadcast %16 : f32 to vector<16x128xf32>
    %18 = arith.mulf %17, %15 : vector<16x128xf32>
    %19 = arith.addf %13, %18 : vector<16x128xf32>
    %c0_13 = arith.constant 0 : index
    %c0_14 = arith.constant 0 : index
    %c1_15 = arith.constant 1 : index
    %c0_16 = arith.constant 0 : index
    %20 = vector.load %arg1[%c0_13, %c0_14, %c1_15, %c0_16] : memref<1x3x18x256xf32, #tpu.memory_space<vmem>>, vector<1x1x16x128xf32>
    %21 = vector.shape_cast %20 : vector<1x1x16x128xf32> to vector<16x128xf32>
    %c3 = arith.constant 3 : index
    %22 = memref.load %arg2[%c3] : memref<27xf32, #tpu.memory_space<smem>>
    %23 = vector.broadcast %22 : f32 to vector<16x128xf32>
    %24 = arith.mulf %23, %21 : vector<16x128xf32>
    %25 = arith.addf %19, %24 : vector<16x128xf32>
    %c0_17 = arith.constant 0 : index
    %c0_18 = arith.constant 0 : index
    %c1_19 = arith.constant 1 : index
    %c1_20 = arith.constant 1 : index
    %26 = vector.load %arg1[%c0_17, %c0_18, %c1_19, %c1_20] : memref<1x3x18x256xf32, #tpu.memory_space<vmem>>, vector<1x1x16x128xf32>
    %27 = vector.shape_cast %26 : vector<1x1x16x128xf32> to vector<16x128xf32>
    %c4 = arith.constant 4 : index
    %28 = memref.load %arg2[%c4] : memref<27xf32, #tpu.memory_space<smem>>
    %29 = vector.broadcast %28 : f32 to vector<16x128xf32>
    %30 = arith.mulf %29, %27 : vector<16x128xf32>
    %31 = arith.addf %25, %30 : vector<16x128xf32>
    %c0_21 = arith.constant 0 : index
    %c0_22 = arith.constant 0 : index
    %c1_23 = arith.constant 1 : index
    %c2_24 = arith.constant 2 : index
    %32 = vector.load %arg1[%c0_21, %c0_22, %c1_23, %c2_24] : memref<1x3x18x256xf32, #tpu.memory_space<vmem>>, vector<1x1x16x128xf32>
    %33 = vector.shape_cast %32 : vector<1x1x16x128xf32> to vector<16x128xf32>
    %c5 = arith.constant 5 : index
    %34 = memref.load %arg2[%c5] : memref<27xf32, #tpu.memory_space<smem>>
    %35 = vector.broadcast %34 : f32 to vector<16x128xf32>
    %36 = arith.mulf %35, %33 : vector<16x128xf32>
    %37 = arith.addf %31, %36 : vector<16x128xf32>
    %c0_25 = arith.constant 0 : index
    %c0_26 = arith.constant 0 : index
    %c2_27 = arith.constant 2 : index
    %c0_28 = arith.constant 0 : index
    %38 = vector.load %arg1[%c0_25, %c0_26, %c2_27, %c0_28] : memref<1x3x18x256xf32, #tpu.memory_space<vmem>>, vector<1x1x16x128xf32>
    %39 = vector.shape_cast %38 : vector<1x1x16x128xf32> to vector<16x128xf32>
    %c6 = arith.constant 6 : index
    %40 = memref.load %arg2[%c6] : memref<27xf32, #tpu.memory_space<smem>>
    %41 = vector.broadcast %40 : f32 to vector<16x128xf32>
    %42 = arith.mulf %41, %39 : vector<16x128xf32>
    %43 = arith.addf %37, %42 : vector<16x128xf32>
    %c0_29 = arith.constant 0 : index
    %c0_30 = arith.constant 0 : index
    %c2_31 = arith.constant 2 : index
    %c1_32 = arith.constant 1 : index
    %44 = vector.load %arg1[%c0_29, %c0_30, %c2_31, %c1_32] : memref<1x3x18x256xf32, #tpu.memory_space<vmem>>, vector<1x1x16x128xf32>
    %45 = vector.shape_cast %44 : vector<1x1x16x128xf32> to vector<16x128xf32>
    %c7 = arith.constant 7 : index
    %46 = memref.load %arg2[%c7] : memref<27xf32, #tpu.memory_space<smem>>
    %47 = vector.broadcast %46 : f32 to vector<16x128xf32>
    %48 = arith.mulf %47, %45 : vector<16x128xf32>
    %49 = arith.addf %43, %48 : vector<16x128xf32>
    %c0_33 = arith.constant 0 : index
    %c0_34 = arith.constant 0 : index
    %c2_35 = arith.constant 2 : index
    %c2_36 = arith.constant 2 : index
    %50 = vector.load %arg1[%c0_33, %c0_34, %c2_35, %c2_36] : memref<1x3x18x256xf32, #tpu.memory_space<vmem>>, vector<1x1x16x128xf32>
    %51 = vector.shape_cast %50 : vector<1x1x16x128xf32> to vector<16x128xf32>
    %c8 = arith.constant 8 : index
    %52 = memref.load %arg2[%c8] : memref<27xf32, #tpu.memory_space<smem>>
    %53 = vector.broadcast %52 : f32 to vector<16x128xf32>
    %54 = arith.mulf %53, %51 : vector<16x128xf32>
    %55 = arith.addf %49, %54 : vector<16x128xf32>
    %c0_37 = arith.constant 0 : index
    %c1_38 = arith.constant 1 : index
    %c0_39 = arith.constant 0 : index
    %c0_40 = arith.constant 0 : index
    %56 = vector.load %arg1[%c0_37, %c1_38, %c0_39, %c0_40] : memref<1x3x18x256xf32, #tpu.memory_space<vmem>>, vector<1x1x16x128xf32>
    %57 = vector.shape_cast %56 : vector<1x1x16x128xf32> to vector<16x128xf32>
    %c9 = arith.constant 9 : index
    %58 = memref.load %arg2[%c9] : memref<27xf32, #tpu.memory_space<smem>>
    %59 = vector.broadcast %58 : f32 to vector<16x128xf32>
    %60 = arith.mulf %59, %57 : vector<16x128xf32>
    %61 = arith.addf %55, %60 : vector<16x128xf32>
    %c0_41 = arith.constant 0 : index
    %c1_42 = arith.constant 1 : index
    %c0_43 = arith.constant 0 : index
    %c1_44 = arith.constant 1 : index
    %62 = vector.load %arg1[%c0_41, %c1_42, %c0_43, %c1_44] : memref<1x3x18x256xf32, #tpu.memory_space<vmem>>, vector<1x1x16x128xf32>
    %63 = vector.shape_cast %62 : vector<1x1x16x128xf32> to vector<16x128xf32>
    %c10 = arith.constant 10 : index
    %64 = memref.load %arg2[%c10] : memref<27xf32, #tpu.memory_space<smem>>
    %65 = vector.broadcast %64 : f32 to vector<16x128xf32>
    %66 = arith.mulf %65, %63 : vector<16x128xf32>
    %67 = arith.addf %61, %66 : vector<16x128xf32>
    %c0_45 = arith.constant 0 : index
    %c1_46 = arith.constant 1 : index
    %c0_47 = arith.constant 0 : index
    %c2_48 = arith.constant 2 : index
    %68 = vector.load %arg1[%c0_45, %c1_46, %c0_47, %c2_48] : memref<1x3x18x256xf32, #tpu.memory_space<vmem>>, vector<1x1x16x128xf32>
    %69 = vector.shape_cast %68 : vector<1x1x16x128xf32> to vector<16x128xf32>
    %c11 = arith.constant 11 : index
    %70 = memref.load %arg2[%c11] : memref<27xf32, #tpu.memory_space<smem>>
    %71 = vector.broadcast %70 : f32 to vector<16x128xf32>
    %72 = arith.mulf %71, %69 : vector<16x128xf32>
    %73 = arith.addf %67, %72 : vector<16x128xf32>
    %c0_49 = arith.constant 0 : index
    %c1_50 = arith.constant 1 : index
    %c1_51 = arith.constant 1 : index
    %c0_52 = arith.constant 0 : index
    %74 = vector.load %arg1[%c0_49, %c1_50, %c1_51, %c0_52] : memref<1x3x18x256xf32, #tpu.memory_space<vmem>>, vector<1x1x16x128xf32>
    %75 = vector.shape_cast %74 : vector<1x1x16x128xf32> to vector<16x128xf32>
    %c12 = arith.constant 12 : index
    %76 = memref.load %arg2[%c12] : memref<27xf32, #tpu.memory_space<smem>>
    %77 = vector.broadcast %76 : f32 to vector<16x128xf32>
    %78 = arith.mulf %77, %75 : vector<16x128xf32>
    %79 = arith.addf %73, %78 : vector<16x128xf32>
    %c0_53 = arith.constant 0 : index
    %c1_54 = arith.constant 1 : index
    %c1_55 = arith.constant 1 : index
    %c1_56 = arith.constant 1 : index
    %80 = vector.load %arg1[%c0_53, %c1_54, %c1_55, %c1_56] : memref<1x3x18x256xf32, #tpu.memory_space<vmem>>, vector<1x1x16x128xf32>
    %81 = vector.shape_cast %80 : vector<1x1x16x128xf32> to vector<16x128xf32>
    %c13 = arith.constant 13 : index
    %82 = memref.load %arg2[%c13] : memref<27xf32, #tpu.memory_space<smem>>
    %83 = vector.broadcast %82 : f32 to vector<16x128xf32>
    %84 = arith.mulf %83, %81 : vector<16x128xf32>
    %85 = arith.addf %79, %84 : vector<16x128xf32>
    %c0_57 = arith.constant 0 : index
    %c1_58 = arith.constant 1 : index
    %c1_59 = arith.constant 1 : index
    %c2_60 = arith.constant 2 : index
    %86 = vector.load %arg1[%c0_57, %c1_58, %c1_59, %c2_60] : memref<1x3x18x256xf32, #tpu.memory_space<vmem>>, vector<1x1x16x128xf32>
    %87 = vector.shape_cast %86 : vector<1x1x16x128xf32> to vector<16x128xf32>
    %c14 = arith.constant 14 : index
    %88 = memref.load %arg2[%c14] : memref<27xf32, #tpu.memory_space<smem>>
    %89 = vector.broadcast %88 : f32 to vector<16x128xf32>
    %90 = arith.mulf %89, %87 : vector<16x128xf32>
    %91 = arith.addf %85, %90 : vector<16x128xf32>
    %c0_61 = arith.constant 0 : index
    %c1_62 = arith.constant 1 : index
    %c2_63 = arith.constant 2 : index
    %c0_64 = arith.constant 0 : index
    %92 = vector.load %arg1[%c0_61, %c1_62, %c2_63, %c0_64] : memref<1x3x18x256xf32, #tpu.memory_space<vmem>>, vector<1x1x16x128xf32>
    %93 = vector.shape_cast %92 : vector<1x1x16x128xf32> to vector<16x128xf32>
    %c15 = arith.constant 15 : index
    %94 = memref.load %arg2[%c15] : memref<27xf32, #tpu.memory_space<smem>>
    %95 = vector.broadcast %94 : f32 to vector<16x128xf32>
    %96 = arith.mulf %95, %93 : vector<16x128xf32>
    %97 = arith.addf %91, %96 : vector<16x128xf32>
    %c0_65 = arith.constant 0 : index
    %c1_66 = arith.constant 1 : index
    %c2_67 = arith.constant 2 : index
    %c1_68 = arith.constant 1 : index
    %98 = vector.load %arg1[%c0_65, %c1_66, %c2_67, %c1_68] : memref<1x3x18x256xf32, #tpu.memory_space<vmem>>, vector<1x1x16x128xf32>
    %99 = vector.shape_cast %98 : vector<1x1x16x128xf32> to vector<16x128xf32>
    %c16 = arith.constant 16 : index
    %100 = memref.load %arg2[%c16] : memref<27xf32, #tpu.memory_space<smem>>
    %101 = vector.broadcast %100 : f32 to vector<16x128xf32>
    %102 = arith.mulf %101, %99 : vector<16x128xf32>
    %103 = arith.addf %97, %102 : vector<16x128xf32>
    %c0_69 = arith.constant 0 : index
    %c1_70 = arith.constant 1 : index
    %c2_71 = arith.constant 2 : index
    %c2_72 = arith.constant 2 : index
    %104 = vector.load %arg1[%c0_69, %c1_70, %c2_71, %c2_72] : memref<1x3x18x256xf32, #tpu.memory_space<vmem>>, vector<1x1x16x128xf32>
    %105 = vector.shape_cast %104 : vector<1x1x16x128xf32> to vector<16x128xf32>
    %c17 = arith.constant 17 : index
    %106 = memref.load %arg2[%c17] : memref<27xf32, #tpu.memory_space<smem>>
    %107 = vector.broadcast %106 : f32 to vector<16x128xf32>
    %108 = arith.mulf %107, %105 : vector<16x128xf32>
    %109 = arith.addf %103, %108 : vector<16x128xf32>
    %c0_73 = arith.constant 0 : index
    %c2_74 = arith.constant 2 : index
    %c0_75 = arith.constant 0 : index
    %c0_76 = arith.constant 0 : index
    %110 = vector.load %arg1[%c0_73, %c2_74, %c0_75, %c0_76] : memref<1x3x18x256xf32, #tpu.memory_space<vmem>>, vector<1x1x16x128xf32>
    %111 = vector.shape_cast %110 : vector<1x1x16x128xf32> to vector<16x128xf32>
    %c18 = arith.constant 18 : index
    %112 = memref.load %arg2[%c18] : memref<27xf32, #tpu.memory_space<smem>>
    %113 = vector.broadcast %112 : f32 to vector<16x128xf32>
    %114 = arith.mulf %113, %111 : vector<16x128xf32>
    %115 = arith.addf %109, %114 : vector<16x128xf32>
    %c0_77 = arith.constant 0 : index
    %c2_78 = arith.constant 2 : index
    %c0_79 = arith.constant 0 : index
    %c1_80 = arith.constant 1 : index
    %116 = vector.load %arg1[%c0_77, %c2_78, %c0_79, %c1_80] : memref<1x3x18x256xf32, #tpu.memory_space<vmem>>, vector<1x1x16x128xf32>
    %117 = vector.shape_cast %116 : vector<1x1x16x128xf32> to vector<16x128xf32>
    %c19 = arith.constant 19 : index
    %118 = memref.load %arg2[%c19] : memref<27xf32, #tpu.memory_space<smem>>
    %119 = vector.broadcast %118 : f32 to vector<16x128xf32>
    %120 = arith.mulf %119, %117 : vector<16x128xf32>
    %121 = arith.addf %115, %120 : vector<16x128xf32>
    %c0_81 = arith.constant 0 : index
    %c2_82 = arith.constant 2 : index
    %c0_83 = arith.constant 0 : index
    %c2_84 = arith.constant 2 : index
    %122 = vector.load %arg1[%c0_81, %c2_82, %c0_83, %c2_84] : memref<1x3x18x256xf32, #tpu.memory_space<vmem>>, vector<1x1x16x128xf32>
    %123 = vector.shape_cast %122 : vector<1x1x16x128xf32> to vector<16x128xf32>
    %c20 = arith.constant 20 : index
    %124 = memref.load %arg2[%c20] : memref<27xf32, #tpu.memory_space<smem>>
    %125 = vector.broadcast %124 : f32 to vector<16x128xf32>
    %126 = arith.mulf %125, %123 : vector<16x128xf32>
    %127 = arith.addf %121, %126 : vector<16x128xf32>
    %c0_85 = arith.constant 0 : index
    %c2_86 = arith.constant 2 : index
    %c1_87 = arith.constant 1 : index
    %c0_88 = arith.constant 0 : index
    %128 = vector.load %arg1[%c0_85, %c2_86, %c1_87, %c0_88] : memref<1x3x18x256xf32, #tpu.memory_space<vmem>>, vector<1x1x16x128xf32>
    %129 = vector.shape_cast %128 : vector<1x1x16x128xf32> to vector<16x128xf32>
    %c21 = arith.constant 21 : index
    %130 = memref.load %arg2[%c21] : memref<27xf32, #tpu.memory_space<smem>>
    %131 = vector.broadcast %130 : f32 to vector<16x128xf32>
    %132 = arith.mulf %131, %129 : vector<16x128xf32>
    %133 = arith.addf %127, %132 : vector<16x128xf32>
    %c0_89 = arith.constant 0 : index
    %c2_90 = arith.constant 2 : index
    %c1_91 = arith.constant 1 : index
    %c1_92 = arith.constant 1 : index
    %134 = vector.load %arg1[%c0_89, %c2_90, %c1_91, %c1_92] : memref<1x3x18x256xf32, #tpu.memory_space<vmem>>, vector<1x1x16x128xf32>
    %135 = vector.shape_cast %134 : vector<1x1x16x128xf32> to vector<16x128xf32>
    %c22 = arith.constant 22 : index
    %136 = memref.load %arg2[%c22] : memref<27xf32, #tpu.memory_space<smem>>
    %137 = vector.broadcast %136 : f32 to vector<16x128xf32>
    %138 = arith.mulf %137, %135 : vector<16x128xf32>
    %139 = arith.addf %133, %138 : vector<16x128xf32>
    %c0_93 = arith.constant 0 : index
    %c2_94 = arith.constant 2 : index
    %c1_95 = arith.constant 1 : index
    %c2_96 = arith.constant 2 : index
    %140 = vector.load %arg1[%c0_93, %c2_94, %c1_95, %c2_96] : memref<1x3x18x256xf32, #tpu.memory_space<vmem>>, vector<1x1x16x128xf32>
    %141 = vector.shape_cast %140 : vector<1x1x16x128xf32> to vector<16x128xf32>
    %c23 = arith.constant 23 : index
    %142 = memref.load %arg2[%c23] : memref<27xf32, #tpu.memory_space<smem>>
    %143 = vector.broadcast %142 : f32 to vector<16x128xf32>
    %144 = arith.mulf %143, %141 : vector<16x128xf32>
    %145 = arith.addf %139, %144 : vector<16x128xf32>
    %c0_97 = arith.constant 0 : index
    %c2_98 = arith.constant 2 : index
    %c2_99 = arith.constant 2 : index
    %c0_100 = arith.constant 0 : index
    %146 = vector.load %arg1[%c0_97, %c2_98, %c2_99, %c0_100] : memref<1x3x18x256xf32, #tpu.memory_space<vmem>>, vector<1x1x16x128xf32>
    %147 = vector.shape_cast %146 : vector<1x1x16x128xf32> to vector<16x128xf32>
    %c24 = arith.constant 24 : index
    %148 = memref.load %arg2[%c24] : memref<27xf32, #tpu.memory_space<smem>>
    %149 = vector.broadcast %148 : f32 to vector<16x128xf32>
    %150 = arith.mulf %149, %147 : vector<16x128xf32>
    %151 = arith.addf %145, %150 : vector<16x128xf32>
    %c0_101 = arith.constant 0 : index
    %c2_102 = arith.constant 2 : index
    %c2_103 = arith.constant 2 : index
    %c1_104 = arith.constant 1 : index
    %152 = vector.load %arg1[%c0_101, %c2_102, %c2_103, %c1_104] : memref<1x3x18x256xf32, #tpu.memory_space<vmem>>, vector<1x1x16x128xf32>
    %153 = vector.shape_cast %152 : vector<1x1x16x128xf32> to vector<16x128xf32>
    %c25 = arith.constant 25 : index
    %154 = memref.load %arg2[%c25] : memref<27xf32, #tpu.memory_space<smem>>
    %155 = vector.broadcast %154 : f32 to vector<16x128xf32>
    %156 = arith.mulf %155, %153 : vector<16x128xf32>
    %157 = arith.addf %151, %156 : vector<16x128xf32>
    %c0_105 = arith.constant 0 : index
    %c2_106 = arith.constant 2 : index
    %c2_107 = arith.constant 2 : index
    %c2_108 = arith.constant 2 : index
    %158 = vector.load %arg1[%c0_105, %c2_106, %c2_107, %c2_108] : memref<1x3x18x256xf32, #tpu.memory_space<vmem>>, vector<1x1x16x128xf32>
    %159 = vector.shape_cast %158 : vector<1x1x16x128xf32> to vector<16x128xf32>
    %c26 = arith.constant 26 : index
    %160 = memref.load %arg2[%c26] : memref<27xf32, #tpu.memory_space<smem>>
    %161 = vector.broadcast %160 : f32 to vector<16x128xf32>
    %162 = arith.mulf %161, %159 : vector<16x128xf32>
    %163 = arith.addf %157, %162 : vector<16x128xf32>
    %164 = math.absf %163 : vector<16x128xf32>
    %cst = arith.constant 0.000000e+00 : f32
    %165 = vector.broadcast %cst : f32 to vector<16x128xf32>
    %166 = arith.subf %165, %164 : vector<16x128xf32>
    %167 = math.exp %166 : vector<16x128xf32>
    %cst_109 = arith.constant 1.000000e+00 : f32
    %168 = vector.broadcast %cst_109 : f32 to vector<16x128xf32>
    %169 = arith.addf %168, %167 : vector<16x128xf32>
    %170 = tpu.reciprocal %169 {approx = true} : vector<16x128xf32> -> vector<16x128xf32>
    %cst_110 = arith.constant 0.000000e+00 : f32
    %171 = vector.broadcast %cst_110 : f32 to vector<16x128xf32>
    %172 = arith.cmpf oge, %163, %171 : vector<16x128xf32>
    %173 = arith.mulf %167, %170 : vector<16x128xf32>
    %174 = arith.select %172, %170, %173 : vector<16x128xi1>, vector<16x128xf32>
    %c0_111 = arith.constant 0 : index
    %c0_112 = arith.constant 0 : index
    %175 = vector.load %arg4[%c0_111, %c0_112] : memref<16x128xf32, #tpu.memory_space<vmem>>, vector<16x128xf32>
    tpu.vector_store %arg4[%c0_111, %c0_112], %174 {strides = array<i32>} : memref<16x128xf32, #tpu.memory_space<vmem>>, vector<16x128xf32>,
    return
  }
  func.func @transform_0(%arg0: i32) -> (i32, i32, i32, i32) {
    %c0_i32 = arith.constant 0 : i32
    %c0_i32_0 = arith.constant 0 : i32
    %c0_i32_1 = arith.constant 0 : i32
    %c0_i32_2 = arith.constant 0 : i32
    return %arg0, %c0_i32, %c0_i32_0, %c0_i32_1 : i32, i32, i32, i32
  }
  func.func @transform_1(%arg0: i32) -> i32 {
    %c0_i32 = arith.constant 0 : i32
    %c0_i32_0 = arith.constant 0 : i32
    return %c0_i32 : i32
  }
  func.func @transform_2(%arg0: i32) -> i32 {
    %c0_i32 = arith.constant 0 : i32
    %c0_i32_0 = arith.constant 0 : i32
    return %c0_i32 : i32
  }
  func.func @transform_3(%arg0: i32) -> (i32, i32) {
    %c0_i32 = arith.constant 0 : i32
    %c0_i32_0 = arith.constant 0 : i32
    return %arg0, %c0_i32 : i32, i32
  }
}

</mosaic_0001>

<bundles_post_ra>
// kernel: mul.0
= control target key start
LH: loop header
LB: loop body
LE: loop exit
PB: predicated region body
PF: predicated region fallthrough
CT: control target
= control target key end

     0   :  { %s34_s0 = inlined_call_operand.vmem [shape: f32[27], index: 0, kind: input, shape index: {}]   ;;  %s35_s1 = inlined_call_operand.vmem [shape: f32[27], index: 1, kind: input, shape index: {}]   ;;  %s36_s2 = inlined_call_operand.vmem [shape: f32[27], index: 2, kind: output, shape index: {}]  }
   0x1   :  { %v3_v0 = vld [vmem:[%s34_s0] sm:$0x1] }
   0x2   :  { %v4_v1 = vld [vmem:[%s35_s1] sm:$0x1] }
   0x3   :  { %v7_v2 = vmul.f32 %v4_v1, %v3_v0 }
   0x5   :  { %9 = vst [vmem:[%s36_s2] sm:$0x1] %v7_v2 }

// kernel: _lambda_.1
= control target key start
LH: loop header
LB: loop body
LE: loop exit
PB: predicated region body
PF: predicated region fallthrough
CT: control target
= control target key end

     0   :  { %s1590_s0 = inlined_call_operand.vmem [shape: f32[3,3,18,256], index: 0, kind: input, shape index: {}]   ;;  %s1591_s1 = inlined_call_operand.vmem [shape: f32[27], index: 1, kind: input, shape index: {}]   ;;  %s1592_s2 = inlined_call_operand.<no memory space> [shape: f32[1], index: 2, kind: input, shape index: {}]   ;;  %s1593_s3 = inlined_call_operand.vmem [shape: f32[48,128], index: 3, kind: output, shape index: {}]  }
   0x1   :  { %8 = sst [smem:[#allocation2]] %s1592_s2 }
   0x2   :  { %9 = vsyncpa [#allocation4], 0  ;;  %s1229_s14 = smov 0  }
   0x3 LB: > { %s1235_s15 = sadd.s32 4294967295, %s1201_s14   ;;  %p1068_p0 = scmp.ge.s32.totalorder %s1201_s14, 1  ;;  %s1201_s14 = sphi %s1229_s14, %s15_s14  }
   0x4   : > { %p114_p1 = scmp.lt.s32.totalorder %s1201_s14, 4  ;;  %s126_s2 = sshll.u32 %s1591_s1, 4  ;;  %s127_s2 = int_to_ptr.vmem [resolvable:$true] %s126_s2 }
   0x5   : > { %p1155_p3 = scmp.eq.s32.totalorder %s1235_s15, 0  ;;  %s1203_s18 = smov [#allocation3]  }
   0x6   : > { %p115_p2 = pnand %p1068_p0, %p114_p1 }
   0x8   : > { %p1151_p4 = pneg %p115_p2  ;;  %150 = sbr.rel (%p115_p2) target bundleno = 355 (0x163), region = 32 }
   0xa   : > { %p1152_p5 = pnand %p1155_p3, %p1151_p4 }
   0xc   : > { %1154 = dma.vmem_to_smem (!%p1152_p5), %s127_s2, 16, %s1203_s18, [#allocation4]  }
   0xd   : > { %1196 = dma.done.wait (%p1155_p3), [#allocation4], 16  }
   0xe   : > { %1198 = vsyncadd (%p1155_p3), [#allocation4], 4294967280 }
   0xf   : > { %157 = sfence }
  0x10   : > { %p176_p6 = scmp.lt.s32.totalorder %s1235_s15, 2  ;;  %s1076_s19 = sld [smem:[#allocation3 + $0x1]]  ;;  %vm262_vm0 = vcmask 1046528   ;;  %vm364_vm1 = vcmask 1045504   ;;  %vm244_vm2 = vcmask 1031168   ;;  %vm219_vm3 = vcmask 1039360  }
  0x11   : > { %s1077_s20 = sld [smem:[#allocation3 + $0x2]]  ;;  %s1204_s27 = smov 127  }
  0x12   : > { %s177_s21 = scalar_select %p176_p6, %s1235_s15, 2 }
  0x13   : > { %s1079_s26 = sld [smem:[#allocation3 + $0x4]]  ;;  %s1205_s28 = smov 126  }
  0x14   : > { %s1146_s22 = smul.u32 144, %s177_s21  ;;  %s1080_s29 = sld [smem:[#allocation3 + $0x5]] }
  0x15   : > { %s1082_s30 = sld [smem:[#allocation3 + $0x7]] }
  0x16   : > { %s1248_s25 = scalar_lea.vmem %s1590_s0, %s1146_s22  ;;  %v202_v0 = vstv %s1076_s19  ;;  %s1083_s4 = sld [smem:[#allocation3 + $0x8]] }
  0x17   : > { %v1251_v1 = vld [vmem:[%s1248_s25 + $0x10] sm:$0xff]  ;;  %v227_v2 = vstv %s1077_s20  ;;  %v1254_v3 = vld [vmem:[%s1248_s25] sm:$0xff]  ;;  %v1262_v7 = vld [vmem:[%s1248_s25 + $0x18] sm:$0xff]  ;;  %s1091_s5 = sld [smem:[#allocation3 + $0xa]] }
  0x18   : > { %v205_v4 = vmul.f32 %v202_v0, %v1251_v1  ;;  %v203_v5 = vmul.f32 %v202_v0, %v1254_v3  ;;  %v228_v6 = vmul.f32 %v227_v2, %v1254_v3  ;;  %v198_v8 = vld [vmem:[%s1248_s25 + $0x8] sm:$0xff]  ;;  %v206_v9 = vmul.f32 %v202_v0, %v1262_v7  ;;  %v272_v13 = vld [vmem:[%s1248_s25] sm:$0xfe]  ;;  %v276_v16 = vld [vmem:[%s1248_s25 + $0x20] sm:$0x1]  ;;  %s1092_s6 = sld [smem:[#allocation3 + $0xb]] }
  0x19   : > { %v204_v10 = vmul.f32 %v202_v0, %v198_v8  ;;  %v279_v11 = vstv %s1079_s26  ;;  %v229_v12 = vmul.f32 %v227_v2, %v198_v8  ;;  %v273_v17 = vld [vmem:[%s1248_s25 + $0x8] sm:$0xfe]  ;;  %v230_v19 = vmul.f32 %v227_v2, %v1251_v1  ;;  %v277_v25 = vld [vmem:[%s1248_s25 + $0x28] sm:$0x1]  ;;  %v374_v45 = vld [vmem:[%s1248_s25] sm:$0xfc] }
  0x1a   : > { %215 = vrot.lane.b32.xlu1 %v205_v4, %s1204_s27  ;;  %211 = vrot.lane.b32.xlu0 %v203_v5, %s1204_s27  ;;  %v280_v14 = vmul.f32 %v279_v11, %v272_v13  ;;  %v282_v15 = vmul.f32 %v279_v11, %v1251_v1  ;;  %v231_v20 = vmul.f32 %v227_v2, %v1262_v7  ;;  %v317_v31 = vstv %s1080_s29  ;;  %v375_v53 = vld [vmem:[%s1248_s25 + $0x8] sm:$0xfc]  ;;  %s1103_s7 = sld [smem:[#allocation3 + $0xd]] }
  0x1b   : > { %236 = vrot.lane.b32.xlu2 %v228_v6, %s1205_s28  ;;  %v284_v22 = vmul.f32 %v279_v11, %v276_v16  ;;  %v281_v23 = vmul.f32 %v279_v11, %v273_v17  ;;  %v283_v24 = vmul.f32 %v279_v11, %v1262_v7  ;;  %v285_v27 = vmul.f32 %v279_v11, %v277_v25  ;;  %v377_v60 = vld [vmem:[%s1248_s25 + $0x28] sm:$0x3]  ;;  %v376_v61 = vld [vmem:[%s1248_s25 + $0x20] sm:$0x3]  ;;  %s1104_s8 = sld [smem:[#allocation3 + $0xe]] }
  0x1c   : > { %v292_v18 = vrot.slane %v280_v14, 1  ;;  %v293_v21 = vrot.slane %v282_v15, 1  ;;  %v319_v33 = vmul.f32 %v317_v31, %v273_v17  ;;  %v321_v34 = vmul.f32 %v317_v31, %v1262_v7  ;;  %s1112_s9 = sld [smem:[#allocation3 + $0x10]] }
  0x1d   : > { %v298_v28 = vrot.slane %v284_v22, 1  ;;  %v295_v29 = vrot.slane %v281_v23, 1  ;;  %v296_v30 = vrot.slane %v283_v24, 1  ;;  %v300_v32 = vrot.slane %v285_v27, 1  ;;  %s1113_s10 = sld [smem:[#allocation3 + $0x11]] }
  0x1e   : > { %v294_v26 = vsel %vm262_vm0, %v292_v18, %v293_v21  ;;  %v318_v37 = vmul.f32 %v317_v31, %v272_v13  ;;  %v320_v38 = vmul.f32 %v317_v31, %v1251_v1  ;;  %v322_v40 = vmul.f32 %v317_v31, %v276_v16  ;;  %s1383_s11 = sld [smem:[#allocation3]] }
  0x1f   : > { %v299_v35 = vsel %vm262_vm0, %v293_v21, %v298_v28  ;;  %v297_v36 = vsel %vm262_vm0, %v295_v29, %v296_v30  ;;  %v301_v39 = vsel %vm262_vm0, %v296_v30, %v300_v32  ;;  %v333_v41 = vrot.slane %v319_v33, 1  ;;  %v1088_v28 = vld [vmem:[%s1248_s25 + $0x38] sm:$0xff]  ;;  %v1323_v30 = vld [vmem:[%s1248_s25 + $0x30] sm:$0xff]  ;;  %v1328_v33 = vld [vmem:[%s1248_s25 + $0x40] sm:$0xff]  ;;  %s1391_s12 = sld [smem:[#allocation2]] }
  0x20   : > { %v334_v42 = vrot.slane %v321_v34, 1  ;;  %v330_v43 = vrot.slane %v318_v37, 1  ;;  %v331_v44 = vrot.slane %v320_v38, 1  ;;  %v379_v46 = vstv %s1082_s30  ;;  %s1121_s13 = sld [smem:[#allocation3 + $0x13]] }
  0x21   : > { %v336_v47 = vrot.slane %v322_v40, 1  ;;  %v380_v50 = vmul.f32 %v379_v46, %v374_v45  ;;  %v382_v51 = vmul.f32 %v379_v46, %v1251_v1  ;;  %v323_v52 = vmul.f32 %v317_v31, %v277_v25  ;;  %s1078_s16 = sld [smem:[#allocation3 + $0x3]] }
  0x22   : > { %217 = vrot.lane.b32.xlu1 %v206_v9, %s1204_s27  ;;  %213 = vrot.lane.b32.xlu0 %v204_v10, %s1204_s27  ;;  %v335_v48 = vsel %vm262_vm0, %v333_v41, %v334_v42  ;;  %v332_v49 = vsel %vm262_vm0, %v330_v43, %v331_v44  ;;  %v381_v55 = vmul.f32 %v379_v46, %v375_v53  ;;  %v417_v6 = vstv %s1083_s4  ;;  %v1097_v41 = vld [vmem:[%s1248_s25 + $0x30] sm:$0xfe]  ;;  %s1122_s17 = sld [smem:[#allocation3 + $0x14]] }
  0x23   : > { %238 = vrot.lane.b32.xlu2 %v229_v12, %s1205_s28  ;;  %v337_v54 = vsel %vm262_vm0, %v331_v44, %v336_v47  ;;  %v383_v56 = vmul.f32 %v379_v46, %v1262_v7  ;;  %v392_v57 = vrot.slane %v380_v50, 2  ;;  %v393_v58 = vrot.slane %v382_v51, 2  ;;  %v1101_v44 = vld [vmem:[%s1248_s25 + $0x50] sm:$0x1]  ;;  %s1133_s2 = sld [smem:[#allocation3 + $0x16]] }
  0x24   : > { %v338_v59 = vrot.slane %v323_v52, 1  ;;  %v395_v62 = vrot.slane %v381_v55, 2  ;;  %v385_v63 = vmul.f32 %v379_v46, %v377_v60  ;;  %v384_v5 = vmul.f32 %v379_v46, %v376_v61  ;;  %s1081_s18 = sld [smem:[#allocation3 + $0x6]] }
  0x25   : > { %v396_v0 = vrot.slane %v383_v56, 2  ;;  %v394_v2 = vsel %vm364_vm1, %v392_v57, %v393_v58  ;;  %v418_v9 = vmul.f32 %v417_v6, %v374_v45  ;;  %v420_v11 = vmul.f32 %v417_v6, %v1251_v1  ;;  %v1098_v45 = vld [vmem:[%s1248_s25 + $0x38] sm:$0xfe]  ;;  %s1443_s19 = sld [smem:[#allocation3 + $0x17]] }
  0x26   : > { %v339_v4 = vsel %vm262_vm0, %v334_v42, %v338_v59  ;;  %v400_v10 = vrot.slane %v385_v63, 2  ;;  %v398_v12 = vrot.slane %v384_v5, 2  ;;  %v422_v17 = vmul.f32 %v417_v6, %v376_v61  ;;  %s1142_s20 = sld [smem:[#allocation3 + $0x19]] }
  0x27   : > { %v397_v8 = vsel %vm364_vm1, %v395_v62, %v396_v0  ;;  %v430_v13 = vrot.slane %v418_v9, 2  ;;  %v431_v15 = vrot.slane %v420_v11, 2  ;;  %v419_v18 = vmul.f32 %v417_v6, %v375_v53  ;;  %v1102_v53 = vld [vmem:[%s1248_s25 + $0x58] sm:$0x1]  ;;  %s1143_s21 = sld [smem:[#allocation3 + $0x1a]] }
  0x28   : > { %v401_v14 = vsel %vm364_vm1, %v396_v0, %v400_v10  ;;  %v399_v16 = vsel %vm364_vm1, %v393_v58, %v398_v12  ;;  %v423_v21 = vmul.f32 %v417_v6, %v377_v60  ;;  %v436_v22 = vrot.slane %v422_v17, 2  ;;  %v1108_v12 = vld [vmem:[%s1248_s25 + $0x30] sm:$0xfc]  ;;  %s1498_s22 = sld [smem:[#allocation3 + $0x9]] }
  0x29   : > { %v433_v23 = vrot.slane %v419_v18, 2  ;;  %v468_v29 = vstv %s1091_s5  ;;  %v580_v59 = vstv %s1104_s8  ;;  %s1096_s23 = sld [smem:[#allocation3 + $0xc]] }
  0x2a   : > { %242 = vrot.lane.b32.xlu1 %v231_v20, %s1205_s28  ;;  %240 = vrot.lane.b32.xlu0 %v230_v19, %s1205_s28  ;;  %v421_v19 = vmul.f32 %v417_v6, %v1262_v7  ;;  %v432_v20 = vsel %vm364_vm1, %v430_v13, %v431_v15  ;;  %v438_v25 = vrot.slane %v423_v21, 2  ;;  %v470_v31 = vmul.f32 %v1088_v28, %v468_v29  ;;  %v1109_v21 = vld [vmem:[%s1248_s25 + $0x38] sm:$0xfc]  ;;  %s1107_s24 = sld [smem:[#allocation3 + $0xf]] }
  0x2b   : > { %302 = vrot.lane.b32.xlu2 %v294_v26, %s1204_s27  ;;  %v437_v26 = vsel %vm364_vm1, %v431_v15, %v436_v22  ;;  %v469_v32 = vmul.f32 %v1323_v30, %v468_v29  ;;  %v471_v34 = vmul.f32 %v1328_v33, %v468_v29  ;;  %v582_v61 = vmul.f32 %v1098_v45, %v580_v59  ;;  %s1116_s26 = sld [smem:[#allocation3 + $0x12]] }
  0x2c   : > { %v434_v24 = vrot.slane %v421_v19, 2  ;;  %v585_v6 = vmul.f32 %v1101_v44, %v580_v59  ;;  %v641_v13 = vstv %s1112_s9 }
  0x2d   : > { %v642_v18 = vmul.f32 %v1108_v12, %v641_v13  ;;  %v644_v19 = vmul.f32 %v1328_v33, %v641_v13 }
  0x2e   : > { %v435_v7 = vsel %vm364_vm1, %v433_v23, %v434_v24  ;;  %v439_v27 = vsel %vm364_vm1, %v434_v24, %v438_v25  ;;  %v643_v23 = vmul.f32 %v1109_v21, %v641_v13 }
  0x2f   : > { %v654_v25 = vrot.slane %v642_v18, 2 }
  0x32   : > { %306 = vrot.lane.b32.xlu1 %v299_v35, %s1204_s27  ;;  %304 = vrot.lane.b32.xlu0 %v297_v36, %s1204_s27  ;;  %v492_v35 = vstv %s1092_s6  ;;  %v1334_v36 = vld [vmem:[%s1248_s25 + $0x48] sm:$0xff] }
  0x33   : > { %308 = vrot.lane.b32.xlu2 %v301_v39, %s1204_s27  ;;  %v493_v37 = vmul.f32 %v1323_v30, %v492_v35  ;;  %v472_v38 = vmul.f32 %v1334_v36, %v468_v29  ;;  %v542_v39 = vstv %s1103_s7  ;;  %v494_v40 = vmul.f32 %v1088_v28, %v492_v35  ;;  %v1110_v28 = vld [vmem:[%s1248_s25 + $0x50] sm:$0x3] }
  0x34   : > { %v543_v42 = vmul.f32 %v1097_v41, %v542_v39  ;;  %v545_v43 = vmul.f32 %v1328_v33, %v542_v39  ;;  %v496_v47 = vmul.f32 %v1334_v36, %v492_v35  ;;  %v547_v50 = vmul.f32 %v1101_v44, %v542_v39 }
  0x35   : > { %v544_v51 = vmul.f32 %v1098_v45, %v542_v39  ;;  %v546_v52 = vmul.f32 %v1334_v36, %v542_v39  ;;  %v548_v55 = vmul.f32 %v1102_v53, %v542_v39  ;;  %v584_v62 = vmul.f32 %v1334_v36, %v580_v59 }
  0x36   : > { %v555_v46 = vrot.slane %v543_v42, 1  ;;  %v561_v56 = vrot.slane %v547_v50, 1  ;;  %v645_v24 = vmul.f32 %v1334_v36, %v641_v13  ;;  %v657_v29 = vrot.slane %v643_v23, 2 }
  0x37   : > { %v558_v57 = vrot.slane %v544_v51, 1  ;;  %v559_v58 = vrot.slane %v546_v52, 1  ;;  %v563_v60 = vrot.slane %v548_v55, 1  ;;  %v597_v9 = vrot.slane %v584_v62, 1 }
  0x38   : > { %v646_v39 = vmul.f32 %v1110_v28, %v641_v13 }
  0x39   : > { %v560_v0 = vsel %vm262_vm0, %v558_v57, %v559_v58  ;;  %v564_v5 = vsel %vm262_vm0, %v559_v58, %v563_v60 }
  0x3a   : > { %342 = vrot.lane.b32.xlu1 %v335_v48, %s1205_s28  ;;  %340 = vrot.lane.b32.xlu0 %v332_v49, %s1205_s28  ;;  %v495_v48 = vmul.f32 %v1328_v33, %v492_v35  ;;  %v556_v49 = vrot.slane %v545_v43, 1  ;;  %v660_v45 = vrot.slane %v646_v39, 2 }
  0x3b   : > { %344 = vrot.lane.b32.xlu2 %v337_v54, %s1205_s28 }
  0x3c   : > { %v557_v54 = vsel %vm262_vm0, %v555_v46, %v556_v49  ;;  %v562_v63 = vsel %vm262_vm0, %v556_v49, %v561_v56 }
  0x42   : > { %402 = vrot.lane.b32.xlu1 %v394_v2, %s1204_s27  ;;  %346 = vrot.lane.b32.xlu0 %v339_v4, %s1205_s28  ;;  %v581_v2 = vmul.f32 %v1097_v41, %v580_v59  ;;  %v583_v4 = vmul.f32 %v1328_v33, %v580_v59 }
  0x43   : > { %404 = vrot.lane.b32.xlu2 %v397_v8, %s1204_s27  ;;  %v596_v8 = vrot.slane %v582_v61, 1 }
  0x44   : > { %v593_v10 = vrot.slane %v581_v2, 1  ;;  %v594_v11 = vrot.slane %v583_v4, 1  ;;  %v188_v4 = vstv %s1391_s12 }
  0x46   : > { %v595_v17 = vsel %vm262_vm0, %v593_v10, %v594_v11 }
  0x4a   : > { %408 = vrot.lane.b32.xlu1 %v401_v14, %s1204_s27  ;;  %406 = vrot.lane.b32.xlu0 %v399_v16, %s1204_s27  ;;  %v599_v14 = vrot.slane %v585_v6, 1  ;;  %v598_v16 = vsel %vm262_vm0, %v596_v8, %v597_v9  ;;  %v1118_v8 = vld [vmem:[%s1248_s25 + $0x68] sm:$0xff] }
  0x4b   : > { %440 = vrot.lane.b32.xlu2 %v432_v20, %s1205_s28  ;;  %v586_v20 = vmul.f32 %v1102_v53, %v580_v59  ;;  %v192_v59 = vstv %s1383_s11 }
  0x4c   : > { %v600_v22 = vsel %vm262_vm0, %v594_v11, %v599_v14  ;;  %v194_v11 = vmul.f32 %v1251_v1, %v192_v59 }
  0x52   : > { %444 = vrot.lane.b32.xlu1 %v437_v26, %s1205_s28  ;;  %442 = vrot.lane.b32.xlu0 %v435_v7, %s1205_s28  ;;  %v655_v26 = vrot.slane %v644_v19, 2  ;;  %v601_v7 = vrot.slane %v586_v20, 1  ;;  %v253_v19 = vld [vmem:[%s1248_s25 + $0x20] sm:$0x1]  ;;  %v255_v20 = vstv %s1078_s16 }
  0x53   : > { %446 = vrot.lane.b32.xlu2 %v439_v27, %s1205_s28  ;;  %v1111_v27 = vld [vmem:[%s1248_s25 + $0x58] sm:$0x3] }
  0x54   : > { %v661_v50 = vsel %vm364_vm1, %v655_v26, %v660_v45 }
  0x5a   : > { %479 = vrot.lane.b32.xlu1 %v470_v31, %s1204_s27  ;;  %477 = vrot.lane.b32.xlu0 %v469_v32, %s1204_s27  ;;  %v647_v32 = vmul.f32 %v1111_v27, %v641_v13 }
  0x5b   : > { %481 = vrot.lane.b32.xlu2 %v471_v34, %s1204_s27  ;;  %v658_v34 = vrot.slane %v645_v24, 2  ;;  %v196_v24 = vadd.f32 %v194_v11, %v188_v4 }
  0x5c   : > { %v662_v43 = vrot.slane %v647_v32, 2 }
  0x5d   : > { %v659_v41 = vsel %vm364_vm1, %v657_v29, %v658_v34  ;;  %v1429_v29 = vld [vmem:[%s1248_s25 + $0x78] sm:$0xff] }
  0x62   : > { %501 = vrot.lane.b32.xlu1 %v493_v37, %s1205_s28  ;;  %483 = vrot.lane.b32.xlu0 %v472_v38, %s1204_s27  ;;  %v656_v37 = vsel %vm364_vm1, %v654_v25, %v655_v26  ;;  %v602_v38 = vsel %vm262_vm0, %v597_v9, %v601_v7  ;;  %v730_v9 = vstv %s1121_s13  ;;  %v257_v26 = vmul.f32 %v255_v20, %v1251_v1 }
  0x63   : > { %503 = vrot.lane.b32.xlu2 %v494_v40, %s1205_s28  ;;  %v679_v40 = vstv %s1113_s10  ;;  %v258_v7 = vmul.f32 %v255_v20, %v253_v19 }
  0x64   : > { %v680_v42 = vmul.f32 %v1108_v12, %v679_v40  ;;  %v682_v44 = vmul.f32 %v1328_v33, %v679_v40  ;;  %v684_v51 = vmul.f32 %v1110_v28, %v679_v40  ;;  %v681_v52 = vmul.f32 %v1109_v21, %v679_v40  ;;  %v251_v21 = vld [vmem:[%s1248_s25] sm:$0xfe] }
  0x65   : > { %v683_v53 = vmul.f32 %v1334_v36, %v679_v40  ;;  %v685_v55 = vmul.f32 %v1111_v27, %v679_v40  ;;  %v256_v27 = vmul.f32 %v255_v20, %v251_v21  ;;  %v754_v28 = vstv %s1122_s17 }
  0x66   : > { %v692_v46 = vrot.slane %v680_v42, 2  ;;  %v693_v49 = vrot.slane %v682_v44, 2  ;;  %v698_v56 = vrot.slane %v684_v51, 2  ;;  %v695_v57 = vrot.slane %v681_v52, 2 }
  0x67   : > { %v696_v58 = vrot.slane %v683_v53, 2  ;;  %v700_v61 = vrot.slane %v685_v55, 2  ;;  %v263_v39 = vrot.slane %v256_v27, 1  ;;  %v804_v44 = vstv %s1133_s2 }
  0x68   : > { %v756_v45 = vmul.f32 %v1118_v8, %v754_v28 }
  0x69   : > { %v697_v2 = vsel %vm364_vm1, %v695_v57, %v696_v58  ;;  %v1128_v57 = vld [vmem:[%s1248_s25 + $0x68] sm:$0xfe] }
  0x6a   : > { %507 = vrot.lane.b32.xlu1 %v496_v47, %s1205_s28  ;;  %505 = vrot.lane.b32.xlu0 %v495_v48, %s1205_s28  ;;  %v663_v48 = vsel %vm364_vm1, %v658_v34, %v662_v43  ;;  %v734_v43 = vmul.f32 %v1429_v29, %v730_v9 }
  0x6b   : > { %565 = vrot.lane.b32.xlu2 %v557_v54, %s1204_s27  ;;  %v694_v54 = vsel %vm364_vm1, %v692_v46, %v693_v49  ;;  %v1127_v46 = vld [vmem:[%s1248_s25 + $0x60] sm:$0xfe] }
  0x72   : > { %569 = vrot.lane.b32.xlu1 %v562_v63, %s1204_s27  ;;  %567 = vrot.lane.b32.xlu0 %v560_v0, %s1204_s27  ;;  %v193_v63 = vmul.f32 %v1254_v3, %v192_v59  ;;  %v699_v0 = vsel %vm364_vm1, %v693_v49, %v698_v56  ;;  %v1409_v3 = vld [vmem:[%s1248_s25 + $0x60] sm:$0xff] }
  0x73   : > { %571 = vrot.lane.b32.xlu2 %v564_v5, %s1204_s27  ;;  %v701_v5 = vsel %vm364_vm1, %v696_v58, %v700_v61  ;;  %v731_v18 = vmul.f32 %v1409_v3, %v730_v9  ;;  %v755_v42 = vmul.f32 %v1409_v3, %v754_v28  ;;  %v1131_v56 = vld [vmem:[%s1248_s25 + $0x80] sm:$0x1] }
  0x74   : > { %v195_v6 = vadd.f32 %v193_v63, %v188_v4 }
  0x75   : > { %v237_v15 = vpop.permute.xlu2 %236 }
  0x7a   : > { %605 = vrot.lane.b32.xlu1 %v598_v16, %s1205_s28  ;;  %603 = vrot.lane.b32.xlu0 %v595_v17, %s1205_s28  ;;  %v732_v17 = vmul.f32 %v1118_v8, %v730_v9  ;;  %v809_v8 = vmul.f32 %v1131_v56, %v804_v44 }
  0x7b   : > { %607 = vrot.lane.b32.xlu2 %v600_v22, %s1205_s28  ;;  %v1421_v22 = vld [vmem:[%s1248_s25 + $0x70] sm:$0xff] }
  0x7c   : > { %v733_v23 = vmul.f32 %v1421_v22, %v730_v9  ;;  %v807_v51 = vmul.f32 %v1421_v22, %v804_v44  ;;  %v757_v61 = vmul.f32 %v1421_v22, %v754_v28  ;;  %v806_v9 = vmul.f32 %v1128_v57, %v804_v44 }
  0x7d   : > { %v239_v31 = vpop.permute.xlu2 %238 }
  0x7e   : > { %v1375_v35 = vsel %vm244_vm2, %v237_v15, %v239_v31  ;;  %v818_v4 = vrot.slane %v807_v51, 1  ;;  %v903_v51 = vstv %s1142_s20 }
  0x82   : > { %664 = vrot.lane.b32.xlu1 %v656_v37, %s1204_s27  ;;  %609 = vrot.lane.b32.xlu0 %v602_v38, %s1205_s28  ;;  %v266_v38 = vrot.slane %v258_v7, 1 }
  0x83   : > { %666 = vrot.lane.b32.xlu2 %v659_v41, %s1204_s27 }
  0x85   : > { %v1386_v47 = vpop.permute.xlu2 %302 }
  0x8a   : > { %670 = vrot.lane.b32.xlu1 %v663_v48, %s1204_s27  ;;  %668 = vrot.lane.b32.xlu0 %v661_v50, %s1204_s27  ;;  %v805_v48 = vmul.f32 %v1127_v46, %v804_v44 }
  0x8b   : > { %702 = vrot.lane.b32.xlu2 %v694_v54, %s1205_s28 }
  0x8c   : > { %v216_v60 = vpop.permute.xlu1 %215  ;;  %v212_v36 = vpop.permute.xlu0 %211  ;;  %v817_v58 = vrot.slane %v805_v48, 1 }
  0x8d   : > { %v1398_v62 = vpop.permute.xlu2 %308 }
  0x8e   : > { %v819_v11 = vsel %vm262_vm0, %v817_v58, %v818_v4 }
  0x92   : > { %706 = vrot.lane.b32.xlu1 %v699_v0, %s1205_s28  ;;  %704 = vrot.lane.b32.xlu0 %v697_v2, %s1205_s28 }
  0x93   : > { %708 = vrot.lane.b32.xlu2 %v701_v5, %s1205_s28  ;;  %v354_v5 = vld [vmem:[%s1248_s25] sm:$0xfc] }
  0x94   : > { %v218_v10 = vpop.permute.xlu1 %217  ;;  %v214_v12 = vpop.permute.xlu0 %213 }
  0x95   : > { %v221_v13 = vsel %vm219_vm3, %v216_v60, %v218_v10  ;;  %v220_v14 = vsel %vm219_vm3, %v212_v36, %v214_v12  ;;  %v1415_v15 = vpop.permute.xlu2 %344  ;;  %v758_v36 = vmul.f32 %v1429_v29, %v754_v28  ;;  %v808_v10 = vmul.f32 %v1429_v29, %v804_v44  ;;  %v355_v28 = vld [vmem:[%s1248_s25 + $0x20] sm:$0x3] }
  0x96   : > { %v224_v16 = vadd.f32 %v220_v14, %v195_v6  ;;  %v225_v31 = vadd.f32 %v221_v13, %v196_v24  ;;  %v357_v6 = vstv %s1081_s18  ;;  %v823_v14 = vrot.slane %v809_v8, 1 }
  0x97   : > { %v358_v12 = vmul.f32 %v357_v6, %v354_v5  ;;  %v359_v13 = vmul.f32 %v357_v6, %v1251_v1 }
  0x98   : > { %v249_v25 = vadd.f32 %v1375_v35, %v224_v16  ;;  %v264_v35 = vrot.slane %v257_v26, 1  ;;  %v820_v16 = vrot.slane %v806_v9, 1 }
  0x99   : > { %v365_v24 = vrot.slane %v358_v12, 2  ;;  %v1140_v12 = vld [vmem:[%s1248_s25 + $0x80] sm:$0x3] }
  0x9a   : > { %741 = vrot.lane.b32.xlu1 %v732_v17, %s1204_s27  ;;  %739 = vrot.lane.b32.xlu0 %v731_v18, %s1204_s27  ;;  %v267_v49 = vsel %vm262_vm0, %v264_v35, %v266_v38  ;;  %v265_v50 = vsel %vm262_vm0, %v263_v39, %v264_v35  ;;  %v821_v17 = vrot.slane %v808_v10, 1  ;;  %v842_v18 = vstv %s1443_s19  ;;  %v1141_v10 = vld [vmem:[%s1248_s25 + $0x88] sm:$0x3] }
  0x9b   : > { %743 = vrot.lane.b32.xlu2 %v733_v23, %s1204_s27  ;;  %v270_v55 = vadd.f32 %v265_v50, %v249_v25  ;;  %v366_v25 = vrot.slane %v359_v13, 2  ;;  %v844_v7 = vmul.f32 %v1128_v57, %v842_v18  ;;  %v846_v27 = vmul.f32 %v1429_v29, %v842_v18  ;;  %v1138_v50 = vld [vmem:[%s1248_s25 + $0x60] sm:$0xfc] }
  0x9c   : > { %v243_v32 = vpop.permute.xlu1 %242  ;;  %v241_v34 = vpop.permute.xlu0 %240  ;;  %v847_v38 = vmul.f32 %v1131_v56, %v842_v18 }
  0x9d   : > { %v246_v37 = vsel %vm244_vm2, %v241_v34, %v243_v32  ;;  %v1433_v40 = vpop.permute.xlu2 %404  ;;  %v822_v32 = vsel %vm262_vm0, %v820_v16, %v821_v17  ;;  %v843_v34 = vmul.f32 %v1127_v46, %v842_v18  ;;  %v367_v39 = vsel %vm364_vm1, %v365_v24, %v366_v25 }
  0x9e   : > { %v250_v41 = vadd.f32 %v246_v37, %v225_v31  ;;  %v824_v31 = vsel %vm262_vm0, %v818_v4, %v823_v14  ;;  %v845_v37 = vmul.f32 %v1421_v22, %v842_v18  ;;  %v941_v24 = vstv %s1143_s21 }
  0xa0   : > { %v271_v53 = vadd.f32 %v267_v49, %v250_v41  ;;  %v360_v41 = vmul.f32 %v357_v6, %v355_v28 }
  0xa2   : > { %763 = vrot.lane.b32.xlu1 %v755_v42, %s1205_s28  ;;  %745 = vrot.lane.b32.xlu0 %v734_v43, %s1204_s27  ;;  %v858_v42 = vrot.slane %v844_v7, 1  ;;  %v859_v43 = vrot.slane %v846_v27, 1  ;;  %v944_v27 = vmul.f32 %v1421_v22, %v941_v24 }
  0xa3   : > { %765 = vrot.lane.b32.xlu2 %v756_v45, %s1205_s28  ;;  %v856_v45 = vrot.slane %v845_v37, 1 }
  0xa4   : > { %v307_v52 = vpop.permute.xlu1 %306  ;;  %v305_v54 = vpop.permute.xlu0 %304 }
  0xa5   : > { %v311_v59 = vsel %vm219_vm3, %v307_v52, %v1398_v62  ;;  %v310_v60 = vsel %vm219_vm3, %v1386_v47, %v305_v54  ;;  %v1454_v63 = vpop.permute.xlu2 %440  ;;  %v1132_v62 = vld [vmem:[%s1248_s25 + $0x88] sm:$0x1]  ;;  %v861_v52 = vrot.slane %v847_v38, 1  ;;  %v458_v38 = vstv %s1498_s22 }
  0xa6   : > { %v315_v0 = vadd.f32 %v311_v59, %v271_v53  ;;  %v314_v2 = vadd.f32 %v310_v60, %v270_v55  ;;  %v810_v47 = vmul.f32 %v1132_v62, %v804_v44  ;;  %v855_v44 = vrot.slane %v843_v34, 1 }
  0xa7   : > { %v368_v55 = vrot.slane %v360_v41, 2  ;;  %v860_v59 = vsel %vm262_vm0, %v858_v42, %v859_v43  ;;  %v862_v4 = vsel %vm262_vm0, %v856_v45, %v861_v52 }
  0xa8   : > { %v825_v21 = vrot.slane %v810_v47, 1  ;;  %v857_v60 = vsel %vm262_vm0, %v855_v44, %v856_v45  ;;  %v955_v44 = vrot.slane %v944_v27, 2 }
  0xa9   : > { %v369_v5 = vsel %vm364_vm1, %v366_v25, %v368_v55 }
  0xaa   : > { %769 = vrot.lane.b32.xlu1 %v758_v36, %s1205_s28  ;;  %767 = vrot.lane.b32.xlu0 %v757_v61, %s1205_s28  ;;  %v826_v35 = vsel %vm262_vm0, %v821_v17, %v825_v21  ;;  %v904_v36 = vmul.f32 %v1138_v50, %v903_v51  ;;  %v906_v61 = vmul.f32 %v1421_v22, %v903_v51 }
  0xab   : > { %827 = vrot.lane.b32.xlu2 %v819_v11, %s1204_s27 }
  0xac   : > { %v343_v19 = vpop.permute.xlu1 %342  ;;  %v341_v20 = vpop.permute.xlu0 %340  ;;  %v916_v6 = vrot.slane %v904_v36, 2  ;;  %v917_v8 = vrot.slane %v906_v61, 2  ;;  %v460_v61 = vmul.f32 %v1328_v33, %v458_v38 }
  0xad   : > { %v348_v23 = vsel %vm244_vm2, %v341_v20, %v343_v19  ;;  %v1466_v1 = vpop.permute.xlu2 %446 }
  0xae   : > { %v352_v26 = vadd.f32 %v348_v23, %v314_v2  ;;  %v848_v2 = vmul.f32 %v1132_v62, %v842_v18  ;;  %v909_v18 = vmul.f32 %v1141_v10, %v903_v51  ;;  %v918_v20 = vsel %vm364_vm1, %v916_v6, %v917_v8 }
  0xaf   : > { %v908_v23 = vmul.f32 %v1140_v12, %v903_v51 }
  0xb0   : > { %v372_v48 = vadd.f32 %v367_v39, %v352_v26  ;;  %v863_v9 = vrot.slane %v848_v2, 1  ;;  %v942_v26 = vmul.f32 %v1138_v50, %v941_v24  ;;  %v924_v7 = vrot.slane %v909_v18, 2 }
  0xb1   : > { %v922_v28 = vrot.slane %v908_v23, 2  ;;  %v459_v50 = vmul.f32 %v1323_v30, %v458_v38 }
  0xb2   : > { %831 = vrot.lane.b32.xlu1 %v824_v31, %s1204_s27  ;;  %829 = vrot.lane.b32.xlu0 %v822_v32, %s1204_s27  ;;  %v864_v21 = vsel %vm262_vm0, %v859_v43, %v863_v9  ;;  %v954_v34 = vrot.slane %v942_v26, 2 }
  0xb3   : > { %833 = vrot.lane.b32.xlu2 %v826_v35, %s1204_s27  ;;  %v923_v45 = vsel %vm364_vm1, %v917_v8, %v922_v28 }
  0xb4   : > { %v403_v46 = vpop.permute.xlu1 %402  ;;  %v347_v49 = vpop.permute.xlu0 %346 }
  0xb5   : > { %v410_v53 = vsel %vm219_vm3, %v403_v46, %v1433_v40  ;;  %v349_v54 = vsel %vm244_vm2, %v1415_v15, %v347_v49  ;;  %v1483_v56 = vpop.permute.xlu2 %481  ;;  %v1139_v40 = vld [vmem:[%s1248_s25 + $0x68] sm:$0xfc]  ;;  %v946_v46 = vmul.f32 %v1140_v12, %v941_v24  ;;  %v945_v49 = vmul.f32 %v1429_v29, %v941_v24 }
  0xb6   : > { %v414_v57 = vadd.f32 %v410_v53, %v372_v48  ;;  %v353_v58 = vadd.f32 %v349_v54, %v315_v0  ;;  %v905_v15 = vmul.f32 %v1139_v40, %v903_v51  ;;  %v907_v0 = vmul.f32 %v1429_v29, %v903_v51 }
  0xb7   : > { %v943_v48 = vmul.f32 %v1139_v40, %v941_v24  ;;  %v947_v51 = vmul.f32 %v1141_v10, %v941_v24  ;;  %v958_v53 = vrot.slane %v945_v49, 2  ;;  %v1095_v10 = vld [vmem:[%s1248_s25 + $0x50] sm:$0x1] }
  0xb8   : > { %v373_v47 = vadd.f32 %v369_v5, %v353_v58  ;;  %v919_v13 = vrot.slane %v905_v15, 2  ;;  %v920_v19 = vrot.slane %v907_v0, 2 }
  0xb9   : > { %v957_v52 = vrot.slane %v943_v48, 2  ;;  %v962_v58 = vrot.slane %v947_v51, 2 }
  0xba   : > { %867 = vrot.lane.b32.xlu1 %v860_v59, %s1205_s28  ;;  %865 = vrot.lane.b32.xlu0 %v857_v60, %s1205_s28  ;;  %v921_v25 = vsel %vm364_vm1, %v919_v13, %v920_v19  ;;  %v925_v43 = vsel %vm364_vm1, %v920_v19, %v924_v7 }
  0xbb   : > { %869 = vrot.lane.b32.xlu2 %v862_v4, %s1205_s28  ;;  %v959_v36 = vsel %vm364_vm1, %v957_v52, %v958_v53  ;;  %v963_v2 = vsel %vm364_vm1, %v958_v53, %v962_v58 }
  0xbc   : > { %v409_v62 = vpop.permute.xlu1 %408  ;;  %v407_v11 = vpop.permute.xlu0 %406 }
  0xbd   : > { %v411_v14 = vsel %vm219_vm3, %v407_v11, %v409_v62  ;;  %v504_v16 = vpop.permute.xlu2 %503  ;;  %v519_v62 = vstv %s1096_s23  ;;  %v1093_v11 = vld [vmem:[%s1248_s25 + $0x30] sm:$0xfe] }
  0xbe   : > { %v415_v17 = vadd.f32 %v411_v14, %v373_v47  ;;  %v521_v47 = vmul.f32 %v1328_v33, %v519_v62  ;;  %v522_v12 = vmul.f32 %v1095_v10, %v519_v62  ;;  %v520_v13 = vmul.f32 %v1093_v11, %v519_v62 }
  0xc0   : > { %v527_v19 = vrot.slane %v521_v47, 1 }
  0xc2   : > { %926 = vrot.lane.b32.xlu1 %v918_v20, %s1204_s27  ;;  %871 = vrot.lane.b32.xlu0 %v864_v21, %s1205_s28  ;;  %v529_v20 = vrot.slane %v522_v12, 1  ;;  %v720_v12 = vstv %s1116_s26 }
  0xc3   : > { %928 = vrot.lane.b32.xlu2 %v921_v25, %s1204_s27 }
  0xc4   : > { %v445_v31 = vpop.permute.xlu1 %444  ;;  %v443_v32 = vpop.permute.xlu0 %442 }
  0xc5   : > { %v449_v37 = vsel %vm244_vm2, %v445_v31, %v1466_v1  ;;  %v448_v35 = vsel %vm244_vm2, %v1454_v63, %v443_v32  ;;  %v1512_v39 = vpop.permute.xlu2 %565  ;;  %v956_v1 = vsel %vm364_vm1, %v954_v34, %v955_v44  ;;  %v960_v63 = vrot.slane %v946_v46, 2 }
  0xc6   : > { %v453_v41 = vadd.f32 %v449_v37, %v415_v17  ;;  %v452_v42 = vadd.f32 %v448_v35, %v414_v57 }
  0xc7   : > { %v961_v60 = vsel %vm364_vm1, %v955_v44, %v960_v63 }
  0xc8   : > { %v461_v57 = vadd.f32 %v459_v50, %v452_v42  ;;  %v462_v15 = vadd.f32 %v460_v61, %v453_v41 }
  0xca   : > { %932 = vrot.lane.b32.xlu1 %v925_v43, %s1204_s27  ;;  %930 = vrot.lane.b32.xlu0 %v923_v45, %s1204_s27  ;;  %s1126_s27 = sld [smem:[#allocation3 + $0x15]] }
  0xcb   : > { %964 = vrot.lane.b32.xlu2 %v956_v1, %s1205_s28 }
  0xcc   : > { %v480_v54 = vpop.permute.xlu1 %479  ;;  %v478_v55 = vpop.permute.xlu0 %477 }
  0xcd   : > { %v485_v29 = vsel %vm219_vm3, %v478_v55, %v480_v54  ;;  %v572_v59 = vpop.permute.xlu2 %571 }
  0xce   : > { %v489_v30 = vadd.f32 %v485_v29, %v461_v57  ;;  %v1105_v29 = vld [vmem:[%s1248_s25 + $0x30] sm:$0xfc] }
  0xd2   : > { %968 = vrot.lane.b32.xlu1 %v961_v60, %s1205_s28  ;;  %966 = vrot.lane.b32.xlu0 %v959_v36, %s1205_s28 }
  0xd3   : > { %970 = vrot.lane.b32.xlu2 %v963_v2, %s1205_s28  ;;  %s1137_s28 = sld [smem:[#allocation3 + $0x18]] }
  0xd4   : > { %v502_v40 = vpop.permute.xlu1 %501  ;;  %v484_v4 = vpop.permute.xlu0 %483 }
  0xd5   : > { %v509_v5 = vsel %vm244_vm2, %v502_v40, %v504_v16  ;;  %v486_v0 = vsel %vm219_vm3, %v1483_v56, %v484_v4  ;;  %v608_v6 = vpop.permute.xlu2 %607  ;;  %v526_v16 = vrot.slane %v520_v13, 1  ;;  %v530_v56 = vsel %vm262_vm0, %v527_v19, %v529_v20 }
  0xd6   : > { %v513_v8 = vadd.f32 %v509_v5, %v489_v30  ;;  %v490_v9 = vadd.f32 %v486_v0, %v462_v15  ;;  %v1106_v30 = vld [vmem:[%s1248_s25 + $0x50] sm:$0x3] }
  0xd7   : > { %v528_v24 = vsel %vm262_vm0, %v526_v16, %v527_v19  ;;  %v1125_v16 = vld [vmem:[%s1248_s25 + $0x80] sm:$0x1] }
  0xd8   : > { %v533_v27 = vadd.f32 %v528_v24, %v513_v8  ;;  %v721_v24 = vmul.f32 %v1409_v3, %v720_v12 }
  0xdc   : > { %v508_v14 = vpop.permute.xlu1 %507  ;;  %v506_v17 = vpop.permute.xlu0 %505 }
  0xdd   : > { %v510_v18 = vsel %vm244_vm2, %v506_v17, %v508_v14  ;;  %v667_v21 = vpop.permute.xlu2 %666  ;;  %v781_v17 = vstv %s1126_s27 }
  0xde   : > { %v514_v23 = vadd.f32 %v510_v18, %v490_v9  ;;  %v1123_v18 = vld [vmem:[%s1248_s25 + $0x60] sm:$0xfe] }
  0xe0   : > { %v534_v26 = vadd.f32 %v530_v56, %v514_v23 }
  0xe4   : > { %v570_v25 = vpop.permute.xlu1 %569  ;;  %v568_v7 = vpop.permute.xlu0 %567 }
  0xe5   : > { %v574_v28 = vsel %vm219_vm3, %v570_v25, %v572_v59  ;;  %v573_v31 = vsel %vm219_vm3, %v1512_v39, %v568_v7  ;;  %v703_v37 = vpop.permute.xlu2 %702  ;;  %v620_v59 = vstv %s1107_s24  ;;  %v783_v7 = vmul.f32 %v1421_v22, %v781_v17 }
  0xe6   : > { %v578_v32 = vadd.f32 %v574_v28, %v534_v26  ;;  %v577_v34 = vadd.f32 %v573_v31, %v533_v27  ;;  %v621_v61 = vmul.f32 %v1105_v29, %v620_v59  ;;  %v622_v2 = vmul.f32 %v1328_v33, %v620_v59 }
  0xe7   : > { %v623_v40 = vmul.f32 %v1106_v30, %v620_v59  ;;  %v782_v27 = vmul.f32 %v1123_v18, %v781_v17  ;;  %v784_v31 = vmul.f32 %v1125_v16, %v781_v17 }
  0xe8   : > { %v627_v4 = vrot.slane %v621_v61, 2  ;;  %v628_v15 = vrot.slane %v622_v2, 2 }
  0xe9   : > { %v630_v5 = vrot.slane %v623_v40, 2 }
  0xea   : > { %v629_v9 = vsel %vm364_vm1, %v627_v4, %v628_v15 }
  0xeb   : > { %v631_v10 = vsel %vm364_vm1, %v628_v15, %v630_v5 }
  0xec   : > { %v606_v35 = vpop.permute.xlu1 %605  ;;  %v604_v38 = vpop.permute.xlu0 %603 }
  0xed   : > { %v611_v41 = vsel %vm244_vm2, %v604_v38, %v606_v35  ;;  %v709_v43 = vpop.permute.xlu2 %708  ;;  %v789_v38 = vrot.slane %v783_v7, 1 }
  0xee   : > { %v615_v42 = vadd.f32 %v611_v41, %v577_v34  ;;  %v788_v41 = vrot.slane %v782_v27, 1 }
  0xf0   : > { %v634_v33 = vadd.f32 %v629_v9, %v615_v42 }
  0xf4   : > { %v665_v44 = vpop.permute.xlu1 %664  ;;  %v610_v45 = vpop.permute.xlu0 %609 }
  0xf5   : > { %v612_v46 = vsel %vm244_vm2, %v608_v6, %v610_v45  ;;  %v744_v49 = vpop.permute.xlu2 %743  ;;  %v672_v62 = vsel %vm219_vm3, %v665_v44, %v667_v21  ;;  %v722_v21 = vmul.f32 %v1421_v22, %v720_v12  ;;  %v1135_v44 = vld [vmem:[%s1248_s25 + $0x60] sm:$0xfc]  ;;  %v882_v45 = vstv %s1137_s28 }
  0xf6   : > { %v616_v48 = vadd.f32 %v612_v46, %v578_v32  ;;  %v676_v19 = vadd.f32 %v672_v62, %v634_v33  ;;  %v884_v29 = vmul.f32 %v1421_v22, %v882_v45 }
  0xf8   : > { %v635_v47 = vadd.f32 %v631_v10, %v616_v48  ;;  %v890_v40 = vrot.slane %v884_v29, 2 }
  0xfc   : > { %v671_v50 = vpop.permute.xlu1 %670  ;;  %v669_v1 = vpop.permute.xlu0 %668 }
  0xfd   : > { %v766_v63 = vpop.permute.xlu2 %765  ;;  %v673_v11 = vsel %vm219_vm3, %v669_v1, %v671_v50 }
  0xfe   : > { %v677_v20 = vadd.f32 %v673_v11, %v635_v47 }
 0x104   : > { %v707_v39 = vpop.permute.xlu1 %706  ;;  %v705_v51 = vpop.permute.xlu0 %704 }
 0x105   : > { %v1544_v54 = vpop.permute.xlu2 %827  ;;  %v711_v13 = vsel %vm244_vm2, %v707_v39, %v709_v43  ;;  %v710_v14 = vsel %vm244_vm2, %v703_v37, %v705_v51  ;;  %v791_v43 = vrot.slane %v784_v31, 1  ;;  %v1136_v39 = vld [vmem:[%s1248_s25 + $0x80] sm:$0x3]  ;;  %s1074_s25 = sshll.u32 %s1235_s15, 1 }
 0x106   : > { %v715_v25 = vadd.f32 %v711_v13, %v677_v20  ;;  %v714_v26 = vadd.f32 %v710_v14, %v676_v19  ;;  %p182_p7 = scmp.lt.s32.totalorder %s1074_s25, 5 }
 0x108   : > { %v723_v37 = vadd.f32 %v721_v24, %v714_v26  ;;  %v724_v35 = vadd.f32 %v722_v21, %v715_v25  ;;  %s1595_s25 = smov (!%p182_p7, %s1074_s25), 5 }
 0x109   : > { %s1075_s29 = sshll.u32 %s1595_s25, 3 }
 0x10a   : > { %s185_s5 = scalar_lea.vmem %s1593_s3, %s1075_s29 }
 0x10c   : > { %v742_v52 = vpop.permute.xlu1 %741  ;;  %v740_v53 = vpop.permute.xlu0 %739 }
 0x10d   : > { %v1546_v58 = vpop.permute.xlu2 %833  ;;  %v747_v32 = vsel %vm219_vm3, %v740_v53, %v742_v52  ;;  %v883_v53 = vmul.f32 %v1135_v44, %v882_v45 }
 0x10e   : > { %v751_v46 = vadd.f32 %v747_v32, %v723_v37 }
 0x10f   : > { %v889_v61 = vrot.slane %v883_v53, 2 }
 0x114   : > { %v764_v55 = vpop.permute.xlu1 %763  ;;  %v746_v57 = vpop.permute.xlu0 %745 }
 0x115   : > { %v870_v0 = vpop.permute.xlu2 %869  ;;  %v748_v34 = vsel %vm219_vm3, %v744_v49, %v746_v57  ;;  %v771_v3 = vsel %vm244_vm2, %v764_v55, %v766_v63  ;;  %v792_v49 = vsel %vm262_vm0, %v789_v38, %v791_v43  ;;  %v790_v57 = vsel %vm262_vm0, %v788_v41, %v789_v38 }
 0x116   : > { %v752_v48 = vadd.f32 %v748_v34, %v724_v35  ;;  %v775_v51 = vadd.f32 %v771_v3, %v751_v46  ;;  %v885_v63 = vmul.f32 %v1136_v39, %v882_v45 }
 0x118   : > { %v892_v15 = vrot.slane %v885_v63, 2 }
 0x11c   : > { %v770_v60 = vpop.permute.xlu1 %769  ;;  %v768_v36 = vpop.permute.xlu0 %767 }
 0x11d   : > { %v929_v28 = vpop.permute.xlu2 %928  ;;  %v772_v42 = vsel %vm244_vm2, %v768_v36, %v770_v60  ;;  %v795_v36 = vadd.f32 %v790_v57, %v775_v51 }
 0x11e   : > { %v776_v52 = vadd.f32 %v772_v42, %v752_v48 }
 0x120   : > { %v796_v60 = vadd.f32 %v792_v49, %v776_v52 }
 0x124   : > { %v832_v6 = vpop.permute.xlu1 %831  ;;  %v830_v8 = vpop.permute.xlu0 %829 }
 0x125   : > { %v965_v55 = vpop.permute.xlu2 %964  ;;  %v836_v59 = vsel %vm219_vm3, %v832_v6, %v1546_v58  ;;  %v835_v30 = vsel %vm219_vm3, %v1544_v54, %v830_v8  ;;  %v891_v58 = vsel %vm364_vm1, %v889_v61, %v890_v40  ;;  %v893_v6 = vsel %vm364_vm1, %v890_v40, %v892_v15 }
 0x126   : > { %v840_v5 = vadd.f32 %v836_v59, %v796_v60  ;;  %v839_v9 = vadd.f32 %v835_v30, %v795_v36 }
 0x12c   : > { %v868_v23 = vpop.permute.xlu1 %867  ;;  %v866_v56 = vpop.permute.xlu0 %865 }
 0x12d   : > { %v873_v2 = vsel %vm244_vm2, %v866_v56, %v868_v23  ;;  %v971_v12 = vpop.permute.xlu2 %970 }
 0x12e   : > { %v877_v62 = vadd.f32 %v873_v2, %v839_v9 }
 0x130   : > { %v896_v33 = vadd.f32 %v891_v58, %v877_v62 }
 0x134   : > { %v927_v50 = vpop.permute.xlu1 %926  ;;  %v872_v1 = vpop.permute.xlu0 %871 }
 0x135   : > { %v874_v4 = vsel %vm244_vm2, %v870_v0, %v872_v1  ;;  %v934_v54 = vsel %vm219_vm3, %v927_v50, %v929_v28 }
 0x136   : > { %v878_v11 = vadd.f32 %v874_v4, %v840_v5  ;;  %v938_v13 = vadd.f32 %v934_v54, %v896_v33 }
 0x138   : > { %v897_v47 = vadd.f32 %v893_v6, %v878_v11 }
 0x13c   : > { %v933_v22 = vpop.permute.xlu1 %932  ;;  %v931_v10 = vpop.permute.xlu0 %930 }
 0x13d   : > { %v935_v8 = vsel %vm219_vm3, %v931_v10, %v933_v22 }
 0x13e   : > { %v939_v0 = vadd.f32 %v935_v8, %v897_v47 }
 0x144   : > { %v969_v14 = vpop.permute.xlu1 %968  ;;  %v967_v17 = vpop.permute.xlu0 %966 }
 0x145   : > { %v973_v18 = vsel %vm244_vm2, %v969_v14, %v971_v12  ;;  %v972_v19 = vsel %vm244_vm2, %v965_v55, %v967_v17 }
 0x146   : > { %v977_v20 = vadd.f32 %v973_v18, %v939_v0  ;;  %v976_v16 = vadd.f32 %v972_v19, %v938_v13 }
 0x148   : > { %v979_v23 = vand.u32 2147483647, %v977_v20  ;;  %v978_v56 = vand.u32 2147483647, %v976_v16  ;;  %vm991_vm4 = vcmp.ge.f32.partialorder %v977_v20, 0.0  ;;  %vm990_vm5 = vcmp.ge.f32.partialorder %v976_v16, 0.0 }
 0x14a   : > { %v981_v24 = vsub.f32 0.0, %v979_v23  ;;  %v980_v21 = vsub.f32 0.0, %v978_v56 }
 0x14c   : > { %v984_v25 = vmul.f32 1.442695, %v981_v24  ;;  %v982_v26 = vmul.f32 1.442695, %v980_v21 }
 0x14e   : > { %1168 = vpow2.f32 %v984_v25 }
 0x14f   : > { %1170 = vpow2.f32 %v982_v26 }
 0x154   : > { %v1169_v7 = vpop.eup %1168 }
 0x155   : > { %v1171_v27 = vpop.eup %1170  ;;  %v987_v28 = vadd.f32 1.0, %v1169_v7 }
 0x156   : > { %v986_v31 = vadd.f32 1.0, %v1171_v27 }
 0x157   : > { %1172 = vrcp.f32 %v987_v28 }
 0x158   : > { %1174 = vrcp.f32 %v986_v31 }
 0x15d   : > { %v1173_v32 = vpop.eup %1172 }
 0x15e   : > { %v1175_v34 = vpop.eup %1174  ;;  %v993_v37 = vmul.f32 %v1173_v32, %v1169_v7 }
 0x15f   : > { %v992_v35 = vmul.f32 %v1175_v34, %v1171_v27 }
 0x160   : > { %v995_v38 = vsel %vm991_vm4, %v1173_v32, %v993_v37 }
 0x161   : > { %v994_v41 = vsel %vm990_vm5, %v1175_v34, %v992_v35  ;;  %997 = vst [vmem:[%s185_s5 + $0x8] sm:$0xff] %v995_v38 }
 0x162   : > { %996 = vst [vmem:[%s185_s5] sm:$0xff] %v994_v41 }
 0x163 PF: > { %s15_s14 = sadd.s32 1, %s1201_s14  }
 0x164   : > { %p12_p8 = scmp.ge.s32.totalorder %s15_s14, 5  }
 0x166   :  { %14 = sbr.rel (!%p12_p8) target bundleno = 3 (0x3), region = 69 }
 0x16b   :  { %1020 = vsyncpa [#allocation4], 1 }
 0x16c   :  { %1022 = vsyncpa [#allocation4 + $0x1], 1 }

</bundles_post_ra>
